<compile_context>
chip_gen: v7x
topology: tpu7x:2x2x1
jax: 0.10.0
libtpu: 0.0.40
codegen_flags: <defaults>
</compile_context>

<pallas_src>
import functools

import jax
import jax.numpy as jnp
from jax.experimental import pallas as pl
from jax.experimental.pallas import tpu as pltpu


_LANE = 128
_SUBLANE_BF16 = 16
_MAX_BATCH_TILE = 256
_NEG_BIG = -1e30  # padded-class mask; must stay f32 (in bf16 it rounds to -inf -> NaN risk)


def _round_up(n, m):
    return ((n + m - 1) // m) * m


# ---------------------------------------------------------------------------
# Fused kernel: one batch tile through the whole MLP.
#   refs = (x_ref, w0_ref, b0_ref, w1_ref, b1_ref, ..., o_ref)
#   x / w are bf16 (MXU operands), biases f32, accumulation + epilogue in f32.
# ---------------------------------------------------------------------------
def _fused_mlp_kernel(n_layers, *refs):
    x_ref = refs[0]
    o_ref = refs[-1]

    h = x_ref[...]  # bf16 (bm, d0_pad)
    for i in range(n_layers):
        w_ref = refs[1 + 2 * i]
        b_ref = refs[2 + 2 * i]
        # MXU matmul: bf16 x bf16 -> f32 accumulator.
        y = jnp.dot(h, w_ref[...], preferred_element_type=jnp.float32)
        y = y + b_ref[...]  # (1, out_pad) f32 broadcasts over batch rows
        if i < n_layers - 1:
            h = jnp.maximum(y, 0.0).astype(jnp.bfloat16)
        else:
            # Padded class lanes already hold exactly -1e30 (zero weight cols + pre-masked
            # final bias), so they lose the max and contribute 0 to the sum -> exact
            # log-softmax over the real classes with no iota/where in the epilogue.
            m = jnp.max(y, axis=-1, keepdims=True)
            lse = jnp.log(jnp.sum(jnp.exp(y - m), axis=-1, keepdims=True)) + m
            o_ref[...] = (y - lse).astype(o_ref.dtype)


def _fused_mlp(x_pad, padded_params, bm):
    """x_pad: (b_pad, d0_pad) bf16; padded_params: [(w bf16 (in_p,out_p), b f32 (1,out_p)), ...]."""
    n_layers = len(padded_params)
    b_pad, d0_pad = x_pad.shape
    out_pad = padded_params[-1][0].shape[1]
    grid = (b_pad // bm,)

    inputs = [x_pad]
    in_specs = [pl.BlockSpec((bm, d0_pad), lambda i: (i, 0))]
    flops = 0
    weight_bytes = 0
    for (w, b) in padded_params:
        inputs.extend([w, b])
        # Constant block index -> weights/biases stay VMEM-resident across the batch grid.
        in_specs.append(pl.BlockSpec(w.shape, lambda i: (0, 0)))
        in_specs.append(pl.BlockSpec(b.shape, lambda i: (0, 0)))
        flops += 2 * b_pad * w.shape[0] * w.shape[1]
        weight_bytes += w.size * w.dtype.itemsize + b.size * b.dtype.itemsize

    bytes_accessed = x_pad.size * x_pad.dtype.itemsize + weight_bytes + b_pad * out_pad * 4
    cost = pl.CostEstimate(
        flops=flops,
        transcendentals=b_pad * out_pad,  # exp in the log-softmax
        bytes_accessed=bytes_accessed,
    )

    # VMEM budget from real buffer sizes: gridded x/out tiles are double-buffered, weights are
    # (conservatively) counted double-buffered too; 4x headroom for intermediate activations /
    # spills, capped safely below v7x's 64 MiB physical VMEM.
    tile_bytes = 2 * (bm * d0_pad * 2 + bm * out_pad * 4) + 2 * weight_bytes
    vmem_limit = int(min(48 * 1024 * 1024, max(8 * 1024 * 1024, 4 * tile_bytes)))

    return pl.pallas_call(
        functools.partial(_fused_mlp_kernel, n_layers),
        out_shape=jax.ShapeDtypeStruct((b_pad, out_pad), jnp.float32),
        grid=grid,
        in_specs=in_specs,
        out_specs=pl.BlockSpec((bm, out_pad), lambda i: (i, 0)),
        cost_estimate=cost,
        compiler_params=pltpu.CompilerParams(
            dimension_semantics=("parallel",),  # v7x: shard batch tiles across both TCs
            vmem_limit_bytes=vmem_limit,
        ),
    )(*inputs)


# ---------------------------------------------------------------------------
# Parameter construction + one-time padding, and the jitted forward pass.
# ---------------------------------------------------------------------------
def init_fcn_classifier_params(key, input_width, input_height, input_channels,
                               hidden_sizes, n_out):
    """Deterministic Linear weights/biases. W: (in, out), b: (1, out), f32."""
    to_linear = input_channels * input_width * input_height
    sizes = [to_linear] + list(hidden_sizes) + [n_out]
    params = []
    for i in range(len(sizes) - 1):
        key, wk, bk = jax.random.split(key, 3)
        fan_in, fan_out = sizes[i], sizes[i + 1]
        w = jax.random.normal(wk, (fan_in, fan_out), dtype=jnp.float32) * 0.02
        b = jax.random.normal(bk, (1, fan_out), dtype=jnp.float32) * 0.02
        params.append((w, b))
    return params


def prepare_padded_params(params, n_out):
    """Pad/cast weights ONCE (outside the per-call path).

    W -> bf16 (in_p, out_p) with zero padding; b -> f32 (1, out_p).  The FINAL layer's padded
    class lanes of the bias are set to -1e30 (weight padding is zero there), which makes the
    in-kernel log-softmax masking free.  Zero padding elsewhere is exact: padded input features
    hit zero weight rows, padded hidden lanes get zero weight cols + zero bias (ReLU -> 0).
    """
    del n_out  # mask location is determined by each layer's true fan_out
    n_layers = len(params)
    padded = []
    for i, (w, b) in enumerate(params):
        fan_in, fan_out = w.shape
        in_p, out_p = _round_up(fan_in, _LANE), _round_up(fan_out, _LANE)
        w_p = (jnp.zeros((in_p, out_p), jnp.float32)
               .at[:fan_in, :fan_out].set(w)
               .astype(jnp.bfloat16))
        if i == n_layers - 1:
            b_p = jnp.full((1, out_p), _NEG_BIG, jnp.float32).at[:, :fan_out].set(b)
        else:
            b_p = jnp.zeros((1, out_p), jnp.float32).at[:, :fan_out].set(b)
        padded.append((w_p, b_p))
    return padded


@functools.partial(jax.jit, static_argnames=("n_out",))
def fcn_classifier_forward(x, padded_params, n_out):
    """x: (B, C, H, W) float32; padded_params from prepare_padded_params.

    Returns dict(output=(B, n_out)) log-probs (f32)."""
    batch = x.shape[0]
    h = x.reshape(batch, -1).astype(jnp.bfloat16)  # flatten (matches torch .view), bf16 operand

    d0 = h.shape[1]
    d0_pad = _round_up(d0, _LANE)
    if batch <= _MAX_BATCH_TILE:
        b_pad = _round_up(max(batch, 1), _SUBLANE_BF16)
        bm = b_pad
    else:
        bm = _MAX_BATCH_TILE
        b_pad = _round_up(batch, bm)

    # Build the padded input directly in bf16: one pad fusion, half the HBM traffic of an
    # f32 pad + cast.  Padded rows/cols are zero (exact; garbage rows are sliced off below).
    x_pad = jnp.zeros((b_pad, d0_pad), jnp.bfloat16).at[:batch, :d0].set(h)

    out_pad = _fused_mlp(x_pad, padded_params, bm)
    return dict(output=out_pad[:batch, :n_out])


if __name__ == "__main__":
    # Small shapes consistent with the module's constructor.
    batch = 2
    input_channels = 4
    input_width = 16
    input_height = 16
    hidden_sizes = (32, 32)
    n_out = 2

    key = jax.random.PRNGKey(0)
    key, xkey = jax.random.split(key)
    x = jax.random.normal(
        xkey, (batch, input_channels, input_width, input_height), dtype=jnp.float32
    )

    params = init_fcn_classifier_params(
        key, input_width, input_height, input_channels, hidden_sizes, n_out
    )
    padded_params = prepare_padded_params(params, n_out)  # one-time pad/cast, outside forward

    result = fcn_classifier_forward(x, padded_params, n_out)
    out = jax.block_until_ready(result["output"])

    # Sanity 1: shape + log-softmax normalization.
    assert out.shape == (batch, n_out)
    probs_sum = jnp.sum(jnp.exp(out), axis=-1)
    assert bool(jnp.all(jnp.abs(probs_sum - 1.0) < 1e-3))

    # Sanity 2: loose comparison against a pure-JAX f32 reference (kernel uses bf16 operands).
    h_ref = x.reshape(batch, -1)
    for i, (w, b) in enumerate(params):
        h_ref = h_ref @ w + b
        if i < len(params) - 1:
            h_ref = jnp.maximum(h_ref, 0.0)
        else:
            h_ref = jax.nn.log_softmax(h_ref, axis=-1)
    assert bool(jnp.all(jnp.abs(out - h_ref) < 1e-1))

    print("KERNEL_OK")
</pallas_src>

<mosaic_0001>
module attributes {stable_mosaic.version = 11 : i64} {
  func.func @_fused_mlp_kernel(%arg0: i32, %arg1: memref<16x1024xbf16, #tpu.memory_space<vmem>>, %arg2: memref<1024x128xbf16, #tpu.memory_space<vmem>>, %arg3: memref<1x128xf32, #tpu.memory_space<vmem>>, %arg4: memref<128x128xbf16, #tpu.memory_space<vmem>>, %arg5: memref<1x128xf32, #tpu.memory_space<vmem>>, %arg6: memref<128x128xbf16, #tpu.memory_space<vmem>>, %arg7: memref<1x128xf32, #tpu.memory_space<vmem>>, %arg8: memref<16x128xf32, #tpu.memory_space<vmem>>) attributes {dimension_semantics = [#tpu.dimension_semantics<parallel>], iteration_bounds = array<i64: 1>, scalar_prefetch = 0 : i64, scratch_operands = 0 : i64, tpu.core_type = #tpu.core_type<tc>, window_params = [{transform_indices = @transform_0, window_bounds = array<i64: 16, 1024>}, {pipeline_mode = #tpu.pipeline_mode<synchronous>, transform_indices = @transform_1, window_bounds = array<i64: 1024, 128>}, {pipeline_mode = #tpu.pipeline_mode<synchronous>, transform_indices = @transform_2, window_bounds = array<i64: 1, 128>}, {pipeline_mode = #tpu.pipeline_mode<synchronous>, transform_indices = @transform_3, window_bounds = array<i64: 128, 128>}, {pipeline_mode = #tpu.pipeline_mode<synchronous>, transform_indices = @transform_4, window_bounds = array<i64: 1, 128>}, {pipeline_mode = #tpu.pipeline_mode<synchronous>, transform_indices = @transform_5, window_bounds = array<i64: 128, 128>}, {pipeline_mode = #tpu.pipeline_mode<synchronous>, transform_indices = @transform_6, window_bounds = array<i64: 1, 128>}, {transform_indices = @transform_7, window_bounds = array<i64: 16, 128>}]} {
    %c0 = arith.constant 0 : index
    %c0_0 = arith.constant 0 : index
    %0 = vector.load %arg1[%c0, %c0_0] : memref<16x1024xbf16, #tpu.memory_space<vmem>>, vector<16x1024xbf16>
    %c0_1 = arith.constant 0 : index
    %c0_2 = arith.constant 0 : index
    %1 = vector.load %arg2[%c0_1, %c0_2] : memref<1024x128xbf16, #tpu.memory_space<vmem>>, vector<1024x128xbf16>
    %cst = arith.constant dense<0.000000e+00> : vector<16x128xf32>
    %2 = tpu.matmul %0, %1, %cst {dimension_numbers = #tpu.dot_dimension_numbers<[1], [0], [0], [1], [0, 0, 1, 1], [], []>} : vector<16x1024xbf16>, vector<1024x128xbf16>, vector<16x128xf32> -> vector<16x128xf32>
    %c0_3 = arith.constant 0 : index
    %c0_4 = arith.constant 0 : index
    %3 = vector.load %arg3[%c0_3, %c0_4] : memref<1x128xf32, #tpu.memory_space<vmem>>, vector<1x128xf32>
    %4 = vector.broadcast %3 : vector<1x128xf32> to vector<16x128xf32>
    %5 = arith.addf %2, %4 : vector<16x128xf32>
    %cst_5 = arith.constant 0.000000e+00 : f32
    %6 = vector.broadcast %cst_5 : f32 to vector<16x128xf32>
    %7 = arith.maximumf %5, %6 : vector<16x128xf32>
    %8 = arith.truncf %7 : vector<16x128xf32> to vector<16x128xbf16>
    %c0_6 = arith.constant 0 : index
    %c0_7 = arith.constant 0 : index
    %9 = vector.load %arg4[%c0_6, %c0_7] : memref<128x128xbf16, #tpu.memory_space<vmem>>, vector<128x128xbf16>
    %cst_8 = arith.constant dense<0.000000e+00> : vector<16x128xf32>
    %10 = tpu.matmul %8, %9, %cst_8 {dimension_numbers = #tpu.dot_dimension_numbers<[1], [0], [0], [1], [0, 0, 1, 1], [], []>} : vector<16x128xbf16>, vector<128x128xbf16>, vector<16x128xf32> -> vector<16x128xf32>
    %c0_9 = arith.constant 0 : index
    %c0_10 = arith.constant 0 : index
    %11 = vector.load %arg5[%c0_9, %c0_10] : memref<1x128xf32, #tpu.memory_space<vmem>>, vector<1x128xf32>
    %12 = vector.broadcast %11 : vector<1x128xf32> to vector<16x128xf32>
    %13 = arith.addf %10, %12 : vector<16x128xf32>
    %cst_11 = arith.constant 0.000000e+00 : f32
    %14 = vector.broadcast %cst_11 : f32 to vector<16x128xf32>
    %15 = arith.maximumf %13, %14 : vector<16x128xf32>
    %16 = arith.truncf %15 : vector<16x128xf32> to vector<16x128xbf16>
    %c0_12 = arith.constant 0 : index
    %c0_13 = arith.constant 0 : index
    %17 = vector.load %arg6[%c0_12, %c0_13] : memref<128x128xbf16, #tpu.memory_space<vmem>>, vector<128x128xbf16>
    %cst_14 = arith.constant dense<0.000000e+00> : vector<16x128xf32>
    %18 = tpu.matmul %16, %17, %cst_14 {dimension_numbers = #tpu.dot_dimension_numbers<[1], [0], [0], [1], [0, 0, 1, 1], [], []>} : vector<16x128xbf16>, vector<128x128xbf16>, vector<16x128xf32> -> vector<16x128xf32>
    %c0_15 = arith.constant 0 : index
    %c0_16 = arith.constant 0 : index
    %19 = vector.load %arg7[%c0_15, %c0_16] : memref<1x128xf32, #tpu.memory_space<vmem>>, vector<1x128xf32>
    %20 = vector.broadcast %19 : vector<1x128xf32> to vector<16x128xf32>
    %21 = arith.addf %18, %20 : vector<16x128xf32>
    %cst_17 = arith.constant dense<0xFF800000> : vector<16xf32>
    %22 = vector.multi_reduction <maximumf>, %21, %cst_17 [1] : vector<16x128xf32> to vector<16xf32>
    %23 = vector.shape_cast %22 : vector<16xf32> to vector<16x1xf32>
    %24 = vector.broadcast %23 : vector<16x1xf32> to vector<16x128xf32>
    %25 = arith.subf %21, %24 : vector<16x128xf32>
    %26 = math.exp %25 : vector<16x128xf32>
    %cst_18 = arith.constant dense<0.000000e+00> : vector<16xf32>
    %27 = vector.multi_reduction <add>, %26, %cst_18 [1] : vector<16x128xf32> to vector<16xf32>
    %28 = vector.shape_cast %27 : vector<16xf32> to vector<16x1xf32>
    %29 = math.log %28 : vector<16x1xf32>
    %30 = arith.addf %29, %23 : vector<16x1xf32>
    %31 = vector.broadcast %30 : vector<16x1xf32> to vector<16x128xf32>
    %32 = arith.subf %21, %31 : vector<16x128xf32>
    %c0_19 = arith.constant 0 : index
    %c0_20 = arith.constant 0 : index
    %33 = vector.load %arg8[%c0_19, %c0_20] : memref<16x128xf32, #tpu.memory_space<vmem>>, vector<16x128xf32>
    tpu.vector_store %arg8[%c0_19, %c0_20], %32 {strides = array<i32>} : memref<16x128xf32, #tpu.memory_space<vmem>>, vector<16x128xf32>,
    return
  }
  func.func @transform_0(%arg0: i32) -> (i32, i32) {
    %c0_i32 = arith.constant 0 : i32
    %c0_i32_0 = arith.constant 0 : i32
    return %arg0, %c0_i32 : i32, i32
  }
  func.func @transform_1(%arg0: i32) -> (i32, i32) {
    %c0_i32 = arith.constant 0 : i32
    %c0_i32_0 = arith.constant 0 : i32
    %c0_i32_1 = arith.constant 0 : i32
    return %c0_i32, %c0_i32_0 : i32, i32
  }
  func.func @transform_2(%arg0: i32) -> (i32, i32) {
    %c0_i32 = arith.constant 0 : i32
    %c0_i32_0 = arith.constant 0 : i32
    %c0_i32_1 = arith.constant 0 : i32
    return %c0_i32, %c0_i32_0 : i32, i32
  }
  func.func @transform_3(%arg0: i32) -> (i32, i32) {
    %c0_i32 = arith.constant 0 : i32
    %c0_i32_0 = arith.constant 0 : i32
    %c0_i32_1 = arith.constant 0 : i32
    return %c0_i32, %c0_i32_0 : i32, i32
  }
  func.func @transform_4(%arg0: i32) -> (i32, i32) {
    %c0_i32 = arith.constant 0 : i32
    %c0_i32_0 = arith.constant 0 : i32
    %c0_i32_1 = arith.constant 0 : i32
    return %c0_i32, %c0_i32_0 : i32, i32
  }
  func.func @transform_5(%arg0: i32) -> (i32, i32) {
    %c0_i32 = arith.constant 0 : i32
    %c0_i32_0 = arith.constant 0 : i32
    %c0_i32_1 = arith.constant 0 : i32
    return %c0_i32, %c0_i32_0 : i32, i32
  }
  func.func @transform_6(%arg0: i32) -> (i32, i32) {
    %c0_i32 = arith.constant 0 : i32
    %c0_i32_0 = arith.constant 0 : i32
    %c0_i32_1 = arith.constant 0 : i32
    return %c0_i32, %c0_i32_0 : i32, i32
  }
  func.func @transform_7(%arg0: i32) -> (i32, i32) {
    %c0_i32 = arith.constant 0 : i32
    %c0_i32_0 = arith.constant 0 : i32
    return %arg0, %c0_i32 : i32, i32
  }
}

</mosaic_0001>

<bundles_post_ra>
// kernel: fcn_classifier_forward.1
= control target key start
LH: loop header
LB: loop body
LE: loop exit
PB: predicated region body
PF: predicated region fallthrough
CT: control target
= control target key end

     0   :  { %12 = vsyncpa [#allocation3], 0  ;;  %s1385_s24 = smov [#allocation2]   ;;  %s1547_s0 = inlined_call_operand.vmem [shape: bf16[16,1024], index: 0, kind: input, shape index: {}]   ;;  %s1548_s1 = inlined_call_operand.hbm [shape: bf16[1024,128], index: 1, kind: input, shape index: {}]   ;;  %s1549_s2 = inlined_call_operand.vmem [shape: f32[1,128], index: 2, kind: input, shape index: {}]   ;;  %s1550_s3 = inlined_call_operand.vmem [shape: bf16[128,128], index: 3, kind: input, shape index: {}]   ;;  %s1551_s4 = inlined_call_operand.vmem [shape: f32[1,128], index: 4, kind: input, shape index: {}]   ;;  %s1552_s5 = inlined_call_operand.vmem [shape: bf16[128,128], index: 5, kind: input, shape index: {}]   ;;  %s1553_s6 = inlined_call_operand.vmem [shape: f32[1,128], index: 6, kind: input, shape index: {}]   ;;  %s1554_s7 = inlined_call_operand.vmem [shape: f32[16,128], index: 7, kind: output, shape index: {}]  }
   0x1   :  { %s20_s25 = sshll.u32 %s1385_s24, 4  ;;  %s1361_s28 = scalar_lea.hbm %s1548_s1, 8192  ;;  %s21_s25 = int_to_ptr.vmem [resolvable:$true] %s20_s25 }
   0x2   :  { %p1362_p0 = scmp.ne.s32.totalorder %s1548_s1, %s1361_s28  ;;  %p1365_p1 = scmp.lt.u32.totalorder %s1361_s28, %s1548_s1 }
   0x4   :  { %p1367_p2 = pnand %p1365_p1, %p1362_p0 }
   0x6   :  { %1370 = shalt.err (!%p1367_p2)
}
   0x7   :  { %s1371_s10 = scalar_lea.vmem %s21_s25, 8192  ;;  %p1376_p4 = scmp.lt.s32.totalorder %s21_s25, %s21_s25 }
   0x8   :  { %p1372_p3 = scmp.ne.s32.totalorder %s21_s25, %s1371_s10  ;;  %p1377_p5 = scmp.lt.s32.totalorder %s1371_s10, %s1371_s10 }
   0xa   :  { %p1378_p6 = por %p1377_p5, %p1376_p4 }
   0xc   :  { %p1379_p7 = pnand %p1378_p6, %p1372_p3 }
   0xe   :  { %1382 = shalt.err (!%p1379_p7)
}
   0xf   :  { %s1386_s11 = smov 64   ;;  %s1387_s12 = smov 4  }
  0x10   :  { %26 = dma.hbm_to_vmem [thread:$0]  %s1548_s1, 8192, %s21_s25, [#allocation3], %s1386_s11, %s1386_s11, %s1387_s12  }
  0x11   :  { %1383 = dma.done.wait [#allocation3], 8192  }
  0x12   :  { %1384 = vsyncadd [#allocation3], 4294959104  ;;  %v1273_v0 = vld [vmem:[#allocation2 + $0x40] sm:$0xff]   ;;  %v1277_v4 = vld [vmem:[#allocation2 + $0x48] sm:$0xff]   ;;  %vm1389_vm0 = vmmov 0  }
  0x13   :  { %v1274_v1 = vld [vmem:[#allocation2 + $0xc0] sm:$0xff]   ;;  %1122 = vmatprep.subr.bf16.mxu0 %v1273_v0  ;;  %v1278_v5 = vld [vmem:[#allocation2 + $0xc8] sm:$0xff]   ;;  %v1281_v8 = vld [vmem:[#allocation2 + $0x50] sm:$0xff]  }
  0x14   :  { %v1275_v2 = vld [vmem:[#allocation2] sm:$0xff]   ;;  %1144 = vmatprep.subr.bf16.mxu1 %v1274_v1  ;;  %v1279_v6 = vld [vmem:[#allocation2 + $0x8] sm:$0xff]   ;;  %v1282_v9 = vld [vmem:[#allocation2 + $0xd0] sm:$0xff]  }
  0x15   :  { %v1276_v3 = vld [vmem:[#allocation2 + $0x80] sm:$0xff]   ;;  %1123 = vmatpush3.bf16.msra.mxu0 %v1275_v2  ;;  %v1280_v7 = vld [vmem:[#allocation2 + $0x88] sm:$0xff]   ;;  %v1283_v10 = vld [vmem:[#allocation2 + $0x10] sm:$0xff]  }
  0x16   :  { %1145 = vmatpush3.bf16.msra.mxu1 %v1276_v3  ;;  %1124 = vmatprep.subr.bf16.mxu0 %v1277_v4  ;;  %v1284_v11 = vld [vmem:[#allocation2 + $0x90] sm:$0xff]   ;;  %v1285_v12 = vld [vmem:[#allocation2 + $0x58] sm:$0xff]   ;;  %v1289_v16 = vld [vmem:[#allocation2 + $0x60] sm:$0xff]  }
  0x17   :  { %1146 = vmatprep.subr.bf16.mxu1 %v1278_v5  ;;  %v1286_v13 = vld [vmem:[#allocation2 + $0xd8] sm:$0xff]   ;;  %v1290_v17 = vld [vmem:[#allocation2 + $0xe0] sm:$0xff]   ;;  %v1293_v20 = vld [vmem:[#allocation2 + $0x68] sm:$0xff]  }
  0x18   :  { %v1287_v14 = vld [vmem:[#allocation2 + $0x18] sm:$0xff]   ;;  %v1291_v18 = vld [vmem:[#allocation2 + $0x20] sm:$0xff]   ;;  %v1294_v21 = vld [vmem:[#allocation2 + $0xe8] sm:$0xff]  }
  0x19   :  { %1125 = vmatpush3.bf16.msra.mxu0 %v1279_v6  ;;  %v1288_v15 = vld [vmem:[#allocation2 + $0x98] sm:$0xff]   ;;  %v1292_v19 = vld [vmem:[#allocation2 + $0xa0] sm:$0xff]   ;;  %v1295_v22 = vld [vmem:[#allocation2 + $0x28] sm:$0xff]  }
  0x1a   :  { %1147 = vmatpush3.bf16.msra.mxu1 %v1280_v7  ;;  %1126 = vmatprep.subr.bf16.mxu0 %v1281_v8  ;;  %v1296_v23 = vld [vmem:[#allocation2 + $0xa8] sm:$0xff]   ;;  %v1297_v24 = vld [vmem:[#allocation2 + $0x70] sm:$0xff]   ;;  %v1301_v28 = vld [vmem:[#allocation2 + $0x78] sm:$0xff]  }
  0x1b   :  { %1148 = vmatprep.subr.bf16.mxu1 %v1282_v9  ;;  %v1298_v25 = vld [vmem:[#allocation2 + $0xf0] sm:$0xff]   ;;  %v1302_v29 = vld [vmem:[#allocation2 + $0xf8] sm:$0xff]   ;;  %v41_v32 = vld [vmem:[%s1547_s0] sm:$0xff] }
  0x1c   :  { %v1299_v26 = vld [vmem:[#allocation2 + $0x30] sm:$0xff]   ;;  %v1303_v30 = vld [vmem:[#allocation2 + $0x38] sm:$0xff]   ;;  %v45_v33 = vld [vmem:[%s1547_s0 + $0x20] sm:$0xff] }
  0x1d   :  { %1127 = vmatpush3.bf16.msra.mxu0 %v1283_v10  ;;  %v1300_v27 = vld [vmem:[#allocation2 + $0xb0] sm:$0xff]   ;;  %v1304_v31 = vld [vmem:[#allocation2 + $0xb8] sm:$0xff]   ;;  %v42_v34 = vld [vmem:[%s1547_s0 + $0x8] sm:$0xff]  ;;  %v1032_v35 = vcombine.low %v41_v32, %v45_v33  ;;  %v1033_v36 = vcombine.high %v41_v32, %v45_v33 }
  0x1e   :  { %1149 = vmatpush3.bf16.msra.mxu1 %v1284_v11  ;;  %1128 = vmatprep.subr.bf16.mxu0 %v1285_v12  ;;  %v46_v37 = vld [vmem:[%s1547_s0 + $0x28] sm:$0xff]  ;;  %v1305_v40 = vld [vmem:[#allocation2 + $0x140] sm:$0xff]   ;;  %v1313_v48 = vld [vmem:[#allocation2 + $0x150] sm:$0xff]  }
  0x1f   :  { %1150 = vmatprep.subr.bf16.mxu1 %v1286_v13  ;;  %v1034_v38 = vcombine.low %v42_v34, %v46_v37  ;;  %v1035_v39 = vcombine.high %v42_v34, %v46_v37  ;;  %640 = vmatprep.mubr.bf16.mxu0 %v1033_v36  ;;  %v1306_v41 = vld [vmem:[#allocation2 + $0x1c0] sm:$0xff]   ;;  %v1309_v44 = vld [vmem:[#allocation2 + $0x148] sm:$0xff]   ;;  %v1314_v49 = vld [vmem:[#allocation2 + $0x1d0] sm:$0xff]  }
  0x20   :  { %v1307_v42 = vld [vmem:[#allocation2 + $0x100] sm:$0xff]   ;;  %v1310_v45 = vld [vmem:[#allocation2 + $0x1c8] sm:$0xff]   ;;  %v1315_v50 = vld [vmem:[#allocation2 + $0x110] sm:$0xff]  }
  0x21   :  { %1129 = vmatpush3.bf16.msra.mxu0 %v1287_v14  ;;  %681 = vmatprep.mubr.bf16.mxu1 %v1035_v39  ;;  %v1308_v43 = vld [vmem:[#allocation2 + $0x180] sm:$0xff]   ;;  %v1311_v46 = vld [vmem:[#allocation2 + $0x108] sm:$0xff]   ;;  %v1316_v51 = vld [vmem:[#allocation2 + $0x190] sm:$0xff]  }
  0x22   :  { %1151 = vmatpush3.bf16.msra.mxu1 %v1288_v15  ;;  %1130 = vmatprep.subr.bf16.mxu0 %v1289_v16  ;;  %v1312_v47 = vld [vmem:[#allocation2 + $0x188] sm:$0xff]   ;;  %v1317_v52 = vld [vmem:[#allocation2 + $0x158] sm:$0xff]   ;;  %v1321_v56 = vld [vmem:[#allocation2 + $0x160] sm:$0xff]  }
  0x23   :  { %1152 = vmatprep.subr.bf16.mxu1 %v1290_v17  ;;  %v1318_v53 = vld [vmem:[#allocation2 + $0x1d8] sm:$0xff]   ;;  %v1322_v57 = vld [vmem:[#allocation2 + $0x1e0] sm:$0xff]   ;;  %v1325_v60 = vld [vmem:[#allocation2 + $0x168] sm:$0xff]   ;;  %v1388_v17 = vmov 0.0  }
  0x24   :  { %v1319_v54 = vld [vmem:[#allocation2 + $0x118] sm:$0xff]   ;;  %v1323_v58 = vld [vmem:[#allocation2 + $0x120] sm:$0xff]   ;;  %v1326_v61 = vld [vmem:[#allocation2 + $0x1e8] sm:$0xff]  }
  0x25   :  { %1131 = vmatpush3.bf16.msra.mxu0 %v1291_v18  ;;  %v1320_v55 = vld [vmem:[#allocation2 + $0x198] sm:$0xff]   ;;  %v1324_v59 = vld [vmem:[#allocation2 + $0x1a0] sm:$0xff]   ;;  %v1327_v62 = vld [vmem:[#allocation2 + $0x128] sm:$0xff]  }
  0x26   :  { %1153 = vmatpush3.bf16.msra.mxu1 %v1292_v19  ;;  %1132 = vmatprep.subr.bf16.mxu0 %v1293_v20  ;;  %v1328_v63 = vld [vmem:[#allocation2 + $0x1a8] sm:$0xff]   ;;  %v1329_v0 = vld [vmem:[#allocation2 + $0x170] sm:$0xff]   ;;  %v1333_v4 = vld [vmem:[#allocation2 + $0x178] sm:$0xff]  }
  0x27   :  { %1154 = vmatprep.subr.bf16.mxu1 %v1294_v21  ;;  %v1330_v1 = vld [vmem:[#allocation2 + $0x1f0] sm:$0xff]   ;;  %v1334_v5 = vld [vmem:[#allocation2 + $0x1f8] sm:$0xff]   ;;  %v1337_v16 = vld [vmem:[%s1550_s3] sm:$0xff]  }
  0x28   :  { %v1331_v2 = vld [vmem:[#allocation2 + $0x130] sm:$0xff]   ;;  %v1335_v6 = vld [vmem:[#allocation2 + $0x138] sm:$0xff]   ;;  %v1338_v18 = vld [vmem:[%s1550_s3 + $0x8] sm:$0xff]  }
  0x29   :  { %1133 = vmatpush3.bf16.msra.mxu0 %v1295_v22  ;;  %v1332_v3 = vld [vmem:[#allocation2 + $0x1b0] sm:$0xff]   ;;  %v1336_v7 = vld [vmem:[#allocation2 + $0x1b8] sm:$0xff]   ;;  %v1341_v21 = vld [vmem:[%s1550_s3 + $0x20] sm:$0xff]  }
  0x2a   :  { %1155 = vmatpush3.bf16.msra.mxu1 %v1296_v23  ;;  %1134 = vmatprep.subr.bf16.mxu0 %v1297_v24  ;;  %v43_v8 = vld [vmem:[%s1547_s0 + $0x10] sm:$0xff]  ;;  %v44_v12 = vld [vmem:[%s1547_s0 + $0x18] sm:$0xff]  ;;  %v1342_v22 = vld [vmem:[%s1550_s3 + $0x28] sm:$0xff]  }
  0x2b   :  { %1156 = vmatprep.subr.bf16.mxu1 %v1298_v25  ;;  %v47_v9 = vld [vmem:[%s1547_s0 + $0x30] sm:$0xff]  ;;  %v48_v13 = vld [vmem:[%s1547_s0 + $0x38] sm:$0xff]  ;;  %v1345_v25 = vld [vmem:[%s1552_s5] sm:$0xff]  }
  0x2c   :  { %v1036_v10 = vcombine.low %v43_v8, %v47_v9  ;;  %v1037_v11 = vcombine.high %v43_v8, %v47_v9  ;;  %v1038_v14 = vcombine.low %v44_v12, %v48_v13  ;;  %v1039_v15 = vcombine.high %v44_v12, %v48_v13  ;;  %v1339_v19 = vld [vmem:[%s1550_s3 + $0x10] sm:$0xff]   ;;  %v1340_v20 = vld [vmem:[%s1550_s3 + $0x18] sm:$0xff]   ;;  %v1031_v33 = vld [vmem:[%s1549_s2] ss:$0 sm:$0xff] }
  0x2d   :  { %1135 = vmatpush3.bf16.msra.mxu0 %v1299_v26  ;;  %v1343_v23 = vld [vmem:[%s1550_s3 + $0x30] sm:$0xff]   ;;  %v1344_v24 = vld [vmem:[%s1550_s3 + $0x38] sm:$0xff]   ;;  %v1346_v26 = vld [vmem:[%s1552_s5 + $0x8] sm:$0xff]  }
  0x2e   :  { %1157 = vmatpush3.bf16.msra.mxu1 %v1300_v27  ;;  %1136 = vmatprep.subr.bf16.mxu0 %v1301_v28  ;;  %v1347_v27 = vld [vmem:[%s1552_s5 + $0x10] sm:$0xff]   ;;  %v1348_v28 = vld [vmem:[%s1552_s5 + $0x18] sm:$0xff]  }
  0x2f   :  { %1158 = vmatprep.subr.bf16.mxu1 %v1302_v29  ;;  %v1349_v29 = vld [vmem:[%s1552_s5 + $0x20] sm:$0xff]  }
  0x31   :  { %1137 = vmatpush3.bf16.msra.mxu0 %v1303_v30  ;;  %v1350_v30 = vld [vmem:[%s1552_s5 + $0x28] sm:$0xff]  }
  0x32   :  { %1159 = vmatpush3.bf16.msra.mxu1 %v1304_v31  ;;  %1166 = vmatprep.subr.bf16.mxu0 %v1305_v40 }
  0x33   :  { %1188 = vmatprep.subr.bf16.mxu1 %v1306_v41 }
  0x34   :  { %641 = vmatmul.mubr.bf16.vlgmr.msra.gmra.mrb[0].mxu0 %v1032_v35 }
  0x35   :  { %682 = vmatmul.mubr.bf16.vlgmr.msra.gmra.mrb[0].mxu1 %v1034_v38  ;;  %1167 = vmatpush3.bf16.msra.mxu0 %v1307_v42 }
  0x36   :  { %1189 = vmatpush3.bf16.msra.mxu1 %v1308_v43  ;;  %1168 = vmatprep.subr.bf16.mxu0 %v1309_v44 }
  0x37   :  { %1190 = vmatprep.subr.bf16.mxu1 %v1310_v45  ;;  %722 = vmatprep.mubr.bf16.mxu0 %v1037_v11 }
  0x38   :  { %763 = vmatprep.mubr.bf16.mxu1 %v1039_v15  ;;  %v1113_v15 = vld [vmem:[%s1553_s6] ss:$0 sm:$0xff] }
  0x39   :  { %1169 = vmatpush3.bf16.msra.mxu0 %v1311_v46 }
  0x3a   :  { %1191 = vmatpush3.bf16.msra.mxu1 %v1312_v47  ;;  %1170 = vmatprep.subr.bf16.mxu0 %v1313_v48 }
  0x3b   :  { %1192 = vmatprep.subr.bf16.mxu1 %v1314_v49 }
  0x3d   :  { %1171 = vmatpush3.bf16.msra.mxu0 %v1315_v50 }
  0x3e   :  { %1193 = vmatpush3.bf16.msra.mxu1 %v1316_v51  ;;  %1172 = vmatprep.subr.bf16.mxu0 %v1317_v52 }
  0x3f   :  { %1194 = vmatprep.subr.bf16.mxu1 %v1318_v53 }
  0x41   :  { %1173 = vmatpush3.bf16.msra.mxu0 %v1319_v54 }
  0x42   :  { %1195 = vmatpush3.bf16.msra.mxu1 %v1320_v55  ;;  %1174 = vmatprep.subr.bf16.mxu0 %v1321_v56 }
  0x43   :  { %1196 = vmatprep.subr.bf16.mxu1 %v1322_v57 }
  0x45   :  { %1175 = vmatpush3.bf16.msra.mxu0 %v1323_v58 }
  0x46   :  { %1197 = vmatpush3.bf16.msra.mxu1 %v1324_v59  ;;  %1176 = vmatprep.subr.bf16.mxu0 %v1325_v60 }
  0x47   :  { %1198 = vmatprep.subr.bf16.mxu1 %v1326_v61 }
  0x49   :  { %1177 = vmatpush3.bf16.msra.mxu0 %v1327_v62 }
  0x4a   :  { %1199 = vmatpush3.bf16.msra.mxu1 %v1328_v63  ;;  %1178 = vmatprep.subr.bf16.mxu0 %v1329_v0 }
  0x4b   :  { %1200 = vmatprep.subr.bf16.mxu1 %v1330_v1 }
  0x4d   :  { %1179 = vmatpush3.bf16.msra.mxu0 %v1331_v2 }
  0x4e   :  { %1201 = vmatpush3.bf16.msra.mxu1 %v1332_v3  ;;  %1180 = vmatprep.subr.bf16.mxu0 %v1333_v4  ;;  %v1351_v3 = vld [vmem:[%s1552_s5 + $0x30] sm:$0xff]   ;;  %v1352_v4 = vld [vmem:[%s1552_s5 + $0x38] sm:$0xff]  }
  0x4f   :  { %1202 = vmatprep.subr.bf16.mxu1 %v1334_v5  ;;  %v1104_v5 = vld [vmem:[%s1551_s4] ss:$0 sm:$0xff] }
  0x51   :  { %1181 = vmatpush3.bf16.msra.mxu0 %v1335_v6 }
  0x52   :  { %1203 = vmatpush3.bf16.msra.mxu1 %v1336_v7  ;;  %1228 = vmatprep.subr.bf16.mxu0 %v1388_v17 }
  0x53   :  { %1248 = vmatprep.subr.bf16.mxu1 %v1388_v17 }
  0x54   :  { %723 = vmatmul.mubr.bf16.vlgmr.msra.gmra.mrb[4].mxu0 %v1036_v10 }
  0x55   :  { %764 = vmatmul.mubr.bf16.vlgmr.msra.gmra.mrb[4].mxu1 %v1038_v14  ;;  %1229 = vmatpush3.bf16.msra.mxu0 %v1337_v16 }
  0x56   :  { %1230 = vmatprep.subr.bf16.mxu0 %v1388_v17  ;;  %1244 = vmatprep.mubr.msk.bf16.mxu0 %vm1389_vm0, %v1388_v17 }
  0x57   :  { %1264 = vmatprep.mubr.msk.bf16.mxu1 %vm1389_vm0, %v1388_v17  ;;  %1249 = vmatpush3.bf16.msra.mxu1 %v1345_v25 }
  0x58   :  { %1250 = vmatprep.subr.bf16.mxu1 %v1388_v17 }
  0x59   :  { %1231 = vmatpush3.bf16.msra.mxu0 %v1338_v18 }
  0x5a   :  { %1232 = vmatprep.subr.bf16.mxu0 %v1388_v17 }
  0x5b   :  { %1251 = vmatpush3.bf16.msra.mxu1 %v1346_v26 }
  0x5c   :  { %1252 = vmatprep.subr.bf16.mxu1 %v1388_v17 }
  0x5d   :  { %1233 = vmatpush3.bf16.msra.mxu0 %v1339_v19 }
  0x5e   :  { %1234 = vmatprep.subr.bf16.mxu0 %v1388_v17 }
  0x5f   :  { %1253 = vmatpush3.bf16.msra.mxu1 %v1347_v27 }
  0x60   :  { %1254 = vmatprep.subr.bf16.mxu1 %v1388_v17 }
  0x61   :  { %1235 = vmatpush3.bf16.msra.mxu0 %v1340_v20 }
  0x62   :  { %1236 = vmatprep.subr.bf16.mxu0 %v1388_v17 }
  0x63   :  { %1255 = vmatpush3.bf16.msra.mxu1 %v1348_v28 }
  0x64   :  { %1256 = vmatprep.subr.bf16.mxu1 %v1388_v17 }
  0x65   :  { %1237 = vmatpush3.bf16.msra.mxu0 %v1341_v21 }
  0x66   :  { %1238 = vmatprep.subr.bf16.mxu0 %v1388_v17 }
  0x67   :  { %1257 = vmatpush3.bf16.msra.mxu1 %v1349_v29 }
  0x68   :  { %1258 = vmatprep.subr.bf16.mxu1 %v1388_v17 }
  0x69   :  { %1239 = vmatpush3.bf16.msra.mxu0 %v1342_v22 }
  0x6a   :  { %1240 = vmatprep.subr.bf16.mxu0 %v1388_v17 }
  0x6b   :  { %1259 = vmatpush3.bf16.msra.mxu1 %v1350_v30 }
  0x6c   :  { %1260 = vmatprep.subr.bf16.mxu1 %v1388_v17 }
  0x6d   :  { %1241 = vmatpush3.bf16.msra.mxu0 %v1343_v23 }
  0x6e   :  { %1242 = vmatprep.subr.bf16.mxu0 %v1388_v17 }
  0x6f   :  { %1261 = vmatpush3.bf16.msra.mxu1 %v1351_v3 }
  0x70   :  { %1262 = vmatprep.subr.bf16.mxu1 %v1388_v17 }
  0x71   :  { %1243 = vmatpush3.bf16.msra.mxu0 %v1344_v24 }
  0x73   :  { %1263 = vmatpush3.bf16.msra.mxu1 %v1352_v4 }
 0x107   :  { %v1138_v31 = vpop.f32.mrb[0].mxu0 }
 0x108   :  { %v1160_v32 = vpop.f32.mrb[0].mxu1  ;;  %v1139_v34 = vpop.f32.mrb[1].mxu0 }
 0x109   :  { %v1140_v35 = vadd.f32 %v1139_v34, %v1138_v31  ;;  %v1161_v36 = vpop.f32.mrb[1].mxu1  ;;  %v1141_v37 = vpop.f32.mrb[2].mxu0 }
 0x10a   :  { %v1162_v38 = vadd.f32 %v1161_v36, %v1160_v32  ;;  %v1163_v39 = vpop.f32.mrb[2].mxu1  ;;  %v1142_v40 = vpop.f32.mrb[3].mxu0 }
 0x10b   :  { %v643_v41 = vadd.f32 %v1140_v35, %v1031_v33  ;;  %v1143_v42 = vadd.f32 %v1142_v40, %v1141_v37  ;;  %v1164_v43 = vpop.f32.mrb[3].mxu1 }
 0x10c   :  { %v1165_v44 = vadd.f32 %v1164_v43, %v1163_v39 }
 0x10d   :  { %v684_v45 = vadd.f32 %v1162_v38, %v643_v41  ;;  %v646_v46 = vadd.f32 %v1143_v42, %v1031_v33 }
 0x10f   :  { %v687_v47 = vadd.f32 %v1165_v44, %v646_v46 }
 0x127   :  { %v1182_v48 = vpop.f32.mrb[4].mxu0 }
 0x128   :  { %v1204_v49 = vpop.f32.mrb[4].mxu1  ;;  %v1183_v50 = vpop.f32.mrb[5].mxu0 }
 0x129   :  { %v1184_v51 = vadd.f32 %v1183_v50, %v1182_v48  ;;  %v1205_v52 = vpop.f32.mrb[5].mxu1  ;;  %v1185_v53 = vpop.f32.mrb[6].mxu0 }
 0x12a   :  { %v1206_v54 = vadd.f32 %v1205_v52, %v1204_v49  ;;  %v1207_v55 = vpop.f32.mrb[6].mxu1  ;;  %v1186_v56 = vpop.f32.mrb[7].mxu0 }
 0x12b   :  { %v725_v57 = vadd.f32 %v1184_v51, %v684_v45  ;;  %v1187_v58 = vadd.f32 %v1186_v56, %v1185_v53  ;;  %v1208_v59 = vpop.f32.mrb[7].mxu1 }
 0x12c   :  { %v1209_v60 = vadd.f32 %v1208_v59, %v1207_v55 }
 0x12d   :  { %v766_v61 = vadd.f32 %v1206_v54, %v725_v57  ;;  %v728_v62 = vadd.f32 %v1187_v58, %v687_v47 }
 0x12f   :  { %v769_v63 = vadd.f32 %v1209_v60, %v728_v62  ;;  %v772_v0 = vmax.f32 %v766_v61, 0.0 }
 0x131   :  { %v773_v1 = vmax.f32 %v769_v63, 0.0 }
 0x133   :  { %v774_v2 = vpack.c.bf16 %v773_v1, %v772_v0 }
 0x135   :  { %1245 = vmatmul.mubr.bf16.vlgmr.msra.gmra.mrb[8].mxu0 %v774_v2 }
 0x208   :  { %v880_v6 = vpop.f32.mrb[8].mxu0 }
 0x209   :  { %v881_v7 = vadd.f32 %v1104_v5, %v880_v6  ;;  %v1246_v8 = vpop.f32.mrb[9].mxu0 }
 0x20a   :  { %v883_v9 = vpop.f32.mrb[10].mxu0 }
 0x20b   :  { %v884_v10 = vadd.f32 %v1104_v5, %v883_v9  ;;  %v1247_v11 = vpop.f32.mrb[11].mxu0  ;;  %v887_v12 = vmax.f32 %v881_v7, 0.0 }
 0x20d   :  { %v888_v13 = vmax.f32 %v884_v10, 0.0 }
 0x20f   :  { %v889_v14 = vpack.c.bf16 %v888_v13, %v887_v12 }
 0x211   :  { %1265 = vmatmul.mubr.bf16.vlgmr.msra.gmra.mrb[8].mxu1 %v889_v14 }
 0x2e4   :  { %v995_v16 = vpop.f32.mrb[8].mxu1 }
 0x2e5   :  { %v996_v17 = vadd.f32 %v1113_v15, %v995_v16  ;;  %v1266_v18 = vpop.f32.mrb[9].mxu1 }
 0x2e6   :  { %v998_v19 = vpop.f32.mrb[10].mxu1 }
 0x2e7   :  { %1002 = vmax.xlane.f32.xlu0 %v996_v17  ;;  %v1267_v20 = vpop.f32.mrb[11].mxu1  ;;  %v999_v21 = vadd.f32 %v1113_v15, %v998_v19 }
 0x2eb   :  { %1004 = vmax.xlane.f32.xlu0 %v999_v21 }
 0x374   :  { %v1003_v22 = vpop.xlane.xlu0 %1002 }
 0x375   :  { %v1006_v23 = vsub.f32 %v996_v17, %v1003_v22 }
 0x377   :  { %v1008_v24 = vmul.f32 1.442695, %v1006_v23 }
 0x378   :  { %v1005_v25 = vpop.xlane.xlu0 %1004 }
 0x379   :  { %v1007_v26 = vsub.f32 %v999_v21, %v1005_v25  ;;  %1353 = vpow2.f32 %v1008_v24 }
 0x37b   :  { %v1010_v27 = vmul.f32 1.442695, %v1007_v26 }
 0x37d   :  { %1355 = vpow2.f32 %v1010_v27 }
 0x383   :  { %v1354_v28 = vpop.eup %1353 }
 0x384   :  { %1012 = vadd.xlane.f32.xlu1 %v1354_v28 }
 0x387   :  { %v1356_v29 = vpop.eup %1355 }
 0x388   :  { %1014 = vadd.xlane.f32.xlu1 %v1356_v29 }
 0x411   :  { %v1013_v30 = vpop.xlane.xlu1 %1012 }
 0x412   :  { %1357 = vlog2.f32 %v1013_v30 }
 0x415   :  { %v1015_v31 = vpop.xlane.xlu1 %1014 }
 0x416   :  { %1359 = vlog2.f32 %v1015_v31 }
 0x41c   :  { %v1358_v32 = vpop.eup %1357 }
 0x41d   :  { %v1017_v33 = vmul.f32 0.6931472, %v1358_v32 }
 0x41f   :  { %v1020_v34 = vadd.f32 %v1017_v33, %v1003_v22 }
 0x420   :  { %v1360_v35 = vpop.eup %1359 }
 0x421   :  { %v1022_v36 = vsub.f32 %v996_v17, %v1020_v34  ;;  %v1019_v37 = vmul.f32 0.6931472, %v1360_v35 }
 0x423   :  { %1024 = vst [vmem:[%s1554_s7] sm:$0xff] %v1022_v36  ;;  %v1021_v38 = vadd.f32 %v1019_v37, %v1005_v25 }
 0x425   :  { %v1023_v39 = vsub.f32 %v999_v21, %v1021_v38 }
 0x427   :  { %1025 = vst [vmem:[%s1554_s7 + $0x8] sm:$0xff] %v1023_v39 }
 0x428   :  { %1030 = vsyncpa [#allocation3], 1 }

</bundles_post_ra>
